<compile_context>
chip_gen: v7x
topology: tpu7x:2x2x1
jax: 0.10.0
libtpu: 0.0.40
codegen_flags: <defaults>
</compile_context>

<pallas_src>
import jax
import jax.numpy as jnp
from jax.experimental import pallas as pl
from jax.experimental.pallas import tpu as pltpu


EPS = 1e-6


def _round_up(v, m):
    return ((v + m - 1) // m) * m


def _vmem_capacity_bytes():
    # 64 MiB/TC on v7x, 128 MiB on v5e/v6e; conservative default if the query is
    # unavailable (e.g. CPU interpret mode).
    try:
        return int(pltpu.get_tpu_info().vmem_capacity_bytes)
    except Exception:
        return 128 * 1024 * 1024


def _single_buffer_kwargs():
    # Feature-detect pipeline_mode / pl.Buffered so the kernel still runs on jax
    # builds without multi-buffering control on BlockSpec.
    try:
        kw = dict(pipeline_mode=pl.Buffered(1))
        pl.BlockSpec((8, 128), lambda i, j: (i, j), **kw)
        return kw
    except Exception:
        return {}


def _make_kernel(hidden, dropout_rate, apply_dropout, col_tiled):
    p_drop = float(dropout_rate)
    inv_keep = 1.0 / (1.0 - p_drop) if apply_dropout else 1.0
    inv_nm1 = 1.0 / max(hidden - 1, 1)          # torch.std is unbiased (N-1)

    def kernel(*refs):
        if col_tiled and apply_dropout:
            x_ref, w_ref, ln_ref, b_ref, xr_ref, r_ref, o_ref, n_ref = refs
        elif col_tiled:
            x_ref, w_ref, ln_ref, b_ref, xr_ref, o_ref, n_ref = refs
            r_ref = None
        elif apply_dropout:
            x_ref, w_ref, ln_ref, b_ref, r_ref, o_ref, n_ref = refs
            xr_ref = x_ref
        else:
            x_ref, w_ref, ln_ref, b_ref, o_ref, n_ref = refs
            xr_ref, r_ref = x_ref, None

        j = pl.program_id(1)

        # ---- LayerNorm once per row tile; reused across all output-column tiles ----
        @pl.when(j == 0)
        def _():
            xf = x_ref[...].astype(jnp.float32)                        # (TR, H)
            mean = jnp.mean(xf, axis=-1, keepdims=True)
            xc = xf - mean
            var = jnp.sum(xc * xc, axis=-1, keepdims=True) * inv_nm1   # unbiased
            inv_std = pl.reciprocal(jnp.sqrt(var) + EPS, approx=True)  # EUP slot
            n_ref[...] = (xc * (ln_ref[0:1, :] * inv_std)
                          + ln_ref[1:2, :]).astype(jnp.bfloat16)

        # ---- sublayer: dense projection on the MXU (bf16 operands, f32 accum) ----
        y = jnp.dot(n_ref[...], w_ref[...],
                    preferred_element_type=jnp.float32) + b_ref[...]   # (TR, TN) f32

        # ---- dropout (train mode): single compare + fused select*scale ----
        if apply_dropout:
            y = y * jnp.where(r_ref[...] < p_drop, 0.0, inv_keep)

        # ---- residual add in f32, cast only at the store ----
        o_ref[...] = (xr_ref[...].astype(jnp.float32) + y).astype(o_ref.dtype)

    return kernel


def sublayer_connection(x, w, b, a2, b2, *, dropout_rate=0.0, training=False,
                        seed=0, row_tile=512, max_col_tile=2048):
    """x: [rows, hidden].  Returns x + dropout(LayerNorm(x) @ w + b), in x.dtype."""
    rows, hidden = x.shape
    out_dtype = x.dtype                       # bf16 in -> bf16 out (halves HBM I/O)
    io_bytes = x.dtype.itemsize
    apply_dropout = bool(training) and float(dropout_rate) > 0.0

    # ---- output-column (N) tiling: keeps W + out under VMEM at large hidden ----
    if hidden <= max_col_tile or hidden % 128 != 0:
        col_tile = hidden
    else:
        col_tile = min(_round_up(int(max_col_tile), 128), hidden)
        while hidden % col_tile:
            col_tile -= 128
    n_col_tiles = hidden // col_tile
    col_tiled = n_col_tiles > 1
    # TODO(synk): on v7x with very large hidden, pass max_col_tile=1024 so the
    # double-buffered (hidden, col_tile) bf16 weight tile fits the 64 MiB budget.

    # ---- row tiling: as large as fits VMEM, but never a single grid step ----
    row_tile = max(8, (min(int(row_tile), max(rows, 8)) // 8) * 8)

    cap = _vmem_capacity_bytes()
    budget = int(cap * 0.85)                  # headroom for Mosaic-internal scratch
    w_bufs = 2 if col_tiled else 1            # resident weight -> single buffer

    def vmem_need(rt):
        return (2 * rt * hidden * io_bytes                               # x (LN view)
                + 2 * rt * col_tile * io_bytes                           # out
                + w_bufs * hidden * col_tile * 2                         # W (bf16)
                + 2 * hidden * 4 + 2 * col_tile * 4                      # a_2/b_2, bias
                + (2 * rt * col_tile * io_bytes if col_tiled else 0)     # residual view
                + (2 * rt * col_tile * 4 if apply_dropout else 0)        # dropout mask
                + rt * hidden * 2                                        # LN scratch
                + (2 << 20))                                             # slack

    while vmem_need(row_tile) > budget and row_tile > 64:
        row_tile = max(64, (row_tile // 2 // 8) * 8)

    # >= 2 row tiles so the "parallel" axis can shard across v7x's 2 TensorCores.
    n_row_tiles = max(2, pl.cdiv(rows, row_tile))
    row_tile = _round_up(pl.cdiv(rows, n_row_tiles), 8)
    padded_rows = n_row_tiles * row_tile

    x_in = x if padded_rows == rows else jnp.pad(
        x, ((0, padded_rows - rows), (0, 0)))
    w_bf16 = w.astype(jnp.bfloat16)                             # MXU-native, half VMEM
    ln_params = jnp.stack([a2, b2], axis=0).astype(jnp.float32)  # (2, H)
    bias2d = b.reshape(1, hidden).astype(jnp.float32)            # (1, H)

    if apply_dropout:
        # Host-side uniforms: tiling-independent mask, runs under interpret mode too.
        rand = jax.random.uniform(jax.random.PRNGKey(seed), (rows, hidden),
                                  dtype=jnp.float32)
        if padded_rows != rows:
            rand = jnp.pad(rand, ((0, padded_rows - rows), (0, 0)),
                           constant_values=1.0)      # padded rows kept (sliced away)

    resident_kw = _single_buffer_kwargs()            # pl.Buffered(1) if supported
    in_specs = [
        pl.BlockSpec((row_tile, hidden), lambda i, j: (i, 0)),               # x (LN)
        pl.BlockSpec((hidden, col_tile), lambda i, j: (0, j),
                     **({} if col_tiled else resident_kw)),                  # W
        pl.BlockSpec((2, hidden), lambda i, j: (0, 0), **resident_kw),       # a_2/b_2
        pl.BlockSpec((1, col_tile), lambda i, j: (0, j),
                     **({} if col_tiled else resident_kw)),                  # bias
    ]
    inputs = [x_in, w_bf16, ln_params, bias2d]
    if col_tiled:
        # Column-tiled residual view of x (avoids dynamic lane slicing in-kernel).
        in_specs.append(pl.BlockSpec((row_tile, col_tile), lambda i, j: (i, j)))
        inputs.append(x_in)
    if apply_dropout:
        in_specs.append(pl.BlockSpec((row_tile, col_tile), lambda i, j: (i, j)))
        inputs.append(rand)

    kernel = _make_kernel(hidden, dropout_rate, apply_dropout, col_tiled)

    grid_spec = pltpu.PrefetchScalarGridSpec(
        num_scalar_prefetch=0,
        grid=(n_row_tiles, n_col_tiles),             # rows parallel, N innermost
        in_specs=in_specs,
        out_specs=pl.BlockSpec((row_tile, col_tile), lambda i, j: (i, j)),
        scratch_shapes=[pltpu.VMEM((row_tile, hidden), jnp.bfloat16)],   # LN(x) tile
    )

    need = vmem_need(row_tile)
    vmem_limit = int(min(budget, max(32 * 1024 * 1024, 2 * need)))

    cost = pl.CostEstimate(
        flops=2 * padded_rows * hidden * hidden,
        transcendentals=2 * padded_rows,             # sqrt + reciprocal per row
        bytes_accessed=((2 + (1 if col_tiled else 0)) * padded_rows * hidden * io_bytes
                        + hidden * hidden * 2 + 3 * hidden * 4
                        + (padded_rows * hidden * 4 if apply_dropout else 0)),
    )

    out = pl.pallas_call(
        kernel,
        out_shape=jax.ShapeDtypeStruct((padded_rows, hidden), out_dtype),
        grid_spec=grid_spec,
        compiler_params=pltpu.CompilerParams(
            dimension_semantics=("parallel", "arbitrary"),
            vmem_limit_bytes=vmem_limit),
        cost_estimate=cost,
    )(*inputs)

    return out if padded_rows == rows else out[:rows]


def reference(x, w, b, a2, b2):
    """Pure-JAX reference (eval mode), same bf16-matmul / f32-accum recipe."""
    x = x.astype(jnp.float32)
    hidden = x.shape[-1]
    mean = jnp.mean(x, axis=-1, keepdims=True)
    xc = x - mean
    var = jnp.sum(xc * xc, axis=-1, keepdims=True) / (hidden - 1)   # unbiased
    normed = a2 * xc / (jnp.sqrt(var) + EPS) + b2
    y = jnp.dot(normed.astype(jnp.bfloat16), w.astype(jnp.bfloat16),
                preferred_element_type=jnp.float32) + b
    return x + y


if __name__ == "__main__":
    def make_inputs(rows, hidden, k):
        kx, kw, kb = jax.random.split(k, 3)
        x = jax.random.normal(kx, (rows, hidden), dtype=jnp.float32)
        w = jax.random.normal(kw, (hidden, hidden), dtype=jnp.float32) * 0.05
        b = jax.random.normal(kb, (hidden,), dtype=jnp.float32) * 0.01
        a2 = jnp.ones((hidden,), dtype=jnp.float32)     # LayerNorm.a_2
        b2 = jnp.zeros((hidden,), dtype=jnp.float32)    # LayerNorm.b_2
        return x, w, b, a2, b2

    # --- 1) eval mode (dropout = identity), hidden=128, rows=batch*seq=16 ---
    batch, seq, hidden = 2, 8, 128
    x, w, b, a2, b2 = make_inputs(batch * seq, hidden, jax.random.PRNGKey(0))
    out = jax.block_until_ready(
        sublayer_connection(x, w, b, a2, b2, dropout_rate=0.1, training=False))
    ref = reference(x, w, b, a2, b2)
    err = float(jnp.max(jnp.abs(out - ref)))
    assert out.shape == ref.shape and jnp.allclose(out, ref, atol=1e-2, rtol=1e-2), \
        f"eval mismatch vs reference: max err {err:.3e}"

    # --- 2) eval mode, exercising the output-column (N) tiling path ---
    inp2 = make_inputs(16, 256, jax.random.PRNGKey(1))
    out2 = jax.block_until_ready(
        sublayer_connection(*inp2, training=False, max_col_tile=128))
    ref2 = reference(*inp2)
    err2 = float(jnp.max(jnp.abs(out2 - ref2)))
    assert jnp.allclose(out2, ref2, atol=1e-2, rtol=1e-2), \
        f"N-tiled mismatch vs reference: max err {err2:.3e}"

    # --- 3) bf16 I/O path (halves HBM traffic; LN/accum/residual stay f32 in-kernel) ---
    out_bf = jax.block_until_ready(
        sublayer_connection(x.astype(jnp.bfloat16), w, b, a2, b2, training=False))
    assert out_bf.dtype == jnp.bfloat16
    assert bool(jnp.all(jnp.isfinite(out_bf.astype(jnp.float32))))

    # --- 4) train mode: dropout (Bernoulli keep + 1/(1-p) scaling, mask streamed in) ---
    out_tr = jax.block_until_ready(
        sublayer_connection(x, w, b, a2, b2, dropout_rate=0.1, training=True, seed=7))
    assert bool(jnp.all(jnp.isfinite(out_tr)))
    drop_frac = float(jnp.mean((out_tr == x).astype(jnp.float32)))
    assert 0.02 < drop_frac < 0.30, f"unexpected dropout fraction {drop_frac:.3f}"

    print("KERNEL_OK")
</pallas_src>

<mosaic_0001>
module attributes {stable_mosaic.version = 11 : i64} {
  func.func @kernel(%arg0: i32, %arg1: i32, %arg2: memref<8x128xf32, #tpu.memory_space<vmem>>, %arg3: memref<128x128xbf16, #tpu.memory_space<vmem>>, %arg4: memref<2x128xf32, #tpu.memory_space<vmem>>, %arg5: memref<1x128xf32, #tpu.memory_space<vmem>>, %arg6: memref<8x128xf32, #tpu.memory_space<vmem>>, %arg7: memref<8x128xbf16, #tpu.memory_space<vmem>>) attributes {dimension_semantics = [#tpu.dimension_semantics<parallel>, #tpu.dimension_semantics<arbitrary>], iteration_bounds = array<i64: 2, 1>, scalar_prefetch = 0 : i64, scratch_operands = 1 : i64, tpu.core_type = #tpu.core_type<tc>, window_params = [{transform_indices = @transform_0, window_bounds = array<i64: 8, 128>}, {pipeline_mode = #tpu.pipeline_mode<synchronous>, transform_indices = @transform_1, window_bounds = array<i64: 128, 128>}, {pipeline_mode = #tpu.pipeline_mode<synchronous>, transform_indices = @transform_2, window_bounds = array<i64: 2, 128>}, {pipeline_mode = #tpu.pipeline_mode<synchronous>, transform_indices = @transform_3, window_bounds = array<i64: 1, 128>}, {transform_indices = @transform_4, window_bounds = array<i64: 8, 128>}]} {
    %c0_i32 = arith.constant 0 : i32
    %0 = arith.cmpi eq, %arg1, %c0_i32 : i32
    %1 = arith.extui %0 : i1 to i32
    %c0_i32_0 = arith.constant 0 : i32
    %2 = arith.cmpi ne, %1, %c0_i32_0 : i32
    scf.if %2 {
      %c0_10 = arith.constant 0 : index
      %c0_11 = arith.constant 0 : index
      %12 = vector.load %arg2[%c0_10, %c0_11] : memref<8x128xf32, #tpu.memory_space<vmem>>, vector<8x128xf32>
      %cst_12 = arith.constant dense<0.000000e+00> : vector<8xf32>
      %13 = vector.multi_reduction <add>, %12, %cst_12 [1] : vector<8x128xf32> to vector<8xf32>
      %14 = vector.shape_cast %13 : vector<8xf32> to vector<8x1xf32>
      %cst_13 = arith.constant 1.280000e+02 : f32
      %15 = vector.broadcast %cst_13 : f32 to vector<8x1xf32>
      %16 = arith.divf %14, %15 : vector<8x1xf32>
      %17 = vector.broadcast %16 : vector<8x1xf32> to vector<8x128xf32>
      %18 = arith.subf %12, %17 : vector<8x128xf32>
      %19 = arith.mulf %18, %18 : vector<8x128xf32>
      %cst_14 = arith.constant dense<0.000000e+00> : vector<8xf32>
      %20 = vector.multi_reduction <add>, %19, %cst_14 [1] : vector<8x128xf32> to vector<8xf32>
      %21 = vector.shape_cast %20 : vector<8xf32> to vector<8x1xf32>
      %cst_15 = arith.constant 0.00787401571 : f32
      %22 = vector.broadcast %cst_15 : f32 to vector<8x1xf32>
      %23 = arith.mulf %21, %22 : vector<8x1xf32>
      %24 = math.sqrt %23 : vector<8x1xf32>
      %cst_16 = arith.constant 9.99999997E-7 : f32
      %25 = vector.broadcast %cst_16 : f32 to vector<8x1xf32>
      %26 = arith.addf %24, %25 : vector<8x1xf32>
      %27 = tpu.reciprocal %26 {approx = true} : vector<8x1xf32> -> vector<8x1xf32>
      %c0_17 = arith.constant 0 : index
      %c0_18 = arith.constant 0 : index
      %28 = vector.load %arg4[%c0_17, %c0_18] : memref<2x128xf32, #tpu.memory_space<vmem>>, vector<1x128xf32>
      %29 = vector.broadcast %28 : vector<1x128xf32> to vector<8x128xf32>
      %30 = vector.broadcast %27 : vector<8x1xf32> to vector<8x128xf32>
      %31 = arith.mulf %29, %30 : vector<8x128xf32>
      %32 = arith.mulf %18, %31 : vector<8x128xf32>
      %c1 = arith.constant 1 : index
      %c0_19 = arith.constant 0 : index
      %33 = vector.load %arg4[%c1, %c0_19] : memref<2x128xf32, #tpu.memory_space<vmem>>, vector<1x128xf32>
      %34 = vector.broadcast %33 : vector<1x128xf32> to vector<8x128xf32>
      %35 = arith.addf %32, %34 : vector<8x128xf32>
      %36 = arith.truncf %35 : vector<8x128xf32> to vector<8x128xbf16>
      %c0_20 = arith.constant 0 : index
      %c0_21 = arith.constant 0 : index
      %37 = vector.load %arg7[%c0_20, %c0_21] : memref<8x128xbf16, #tpu.memory_space<vmem>>, vector<8x128xbf16>
      tpu.vector_store %arg7[%c0_20, %c0_21], %36 {strides = array<i32>} : memref<8x128xbf16, #tpu.memory_space<vmem>>, vector<8x128xbf16>,
    } else {
    }
    %c0 = arith.constant 0 : index
    %c0_1 = arith.constant 0 : index
    %3 = vector.load %arg7[%c0, %c0_1] : memref<8x128xbf16, #tpu.memory_space<vmem>>, vector<8x128xbf16>
    %c0_2 = arith.constant 0 : index
    %c0_3 = arith.constant 0 : index
    %4 = vector.load %arg3[%c0_2, %c0_3] : memref<128x128xbf16, #tpu.memory_space<vmem>>, vector<128x128xbf16>
    %cst = arith.constant dense<0.000000e+00> : vector<8x128xf32>
    %5 = tpu.matmul %3, %4, %cst {dimension_numbers = #tpu.dot_dimension_numbers<[1], [0], [0], [1], [0, 0, 1, 1], [], []>} : vector<8x128xbf16>, vector<128x128xbf16>, vector<8x128xf32> -> vector<8x128xf32>
    %c0_4 = arith.constant 0 : index
    %c0_5 = arith.constant 0 : index
    %6 = vector.load %arg5[%c0_4, %c0_5] : memref<1x128xf32, #tpu.memory_space<vmem>>, vector<1x128xf32>
    %7 = vector.broadcast %6 : vector<1x128xf32> to vector<8x128xf32>
    %8 = arith.addf %5, %7 : vector<8x128xf32>
    %c0_6 = arith.constant 0 : index
    %c0_7 = arith.constant 0 : index
    %9 = vector.load %arg2[%c0_6, %c0_7] : memref<8x128xf32, #tpu.memory_space<vmem>>, vector<8x128xf32>
    %10 = arith.addf %9, %8 : vector<8x128xf32>
    %c0_8 = arith.constant 0 : index
    %c0_9 = arith.constant 0 : index
    %11 = vector.load %arg6[%c0_8, %c0_9] : memref<8x128xf32, #tpu.memory_space<vmem>>, vector<8x128xf32>
    tpu.vector_store %arg6[%c0_8, %c0_9], %10 {strides = array<i32>} : memref<8x128xf32, #tpu.memory_space<vmem>>, vector<8x128xf32>,
    return
  }
  func.func @transform_0(%arg0: i32, %arg1: i32) -> (i32, i32) {
    %c0_i32 = arith.constant 0 : i32
    %c0_i32_0 = arith.constant 0 : i32
    return %arg0, %c0_i32 : i32, i32
  }
  func.func @transform_1(%arg0: i32, %arg1: i32) -> (i32, i32) {
    %c0_i32 = arith.constant 0 : i32
    %c0_i32_0 = arith.constant 0 : i32
    return %c0_i32, %arg1 : i32, i32
  }
  func.func @transform_2(%arg0: i32, %arg1: i32) -> (i32, i32) {
    %c0_i32 = arith.constant 0 : i32
    %c0_i32_0 = arith.constant 0 : i32
    %c0_i32_1 = arith.constant 0 : i32
    return %c0_i32, %c0_i32_0 : i32, i32
  }
  func.func @transform_3(%arg0: i32, %arg1: i32) -> (i32, i32) {
    %c0_i32 = arith.constant 0 : i32
    %c0_i32_0 = arith.constant 0 : i32
    return %c0_i32, %arg1 : i32, i32
  }
  func.func @transform_4(%arg0: i32, %arg1: i32) -> (i32, i32) {
    %c0_i32 = arith.constant 0 : i32
    return %arg0, %arg1 : i32, i32
  }
}

</mosaic_0001>

<bundles_post_ra>
// kernel: tpu_custom_call.1
= control target key start
LH: loop header
LB: loop body
LE: loop exit
PB: predicated region body
PF: predicated region fallthrough
CT: control target
= control target key end

     0   :  { %9 = vsyncpa [#allocation4], 0  ;;  %s1090_s0 = inlined_call_operand.hbm [shape: f32[16,128], index: 0, kind: input, shape index: {}]   ;;  %s1091_s1 = inlined_call_operand.hbm [shape: bf16[128,128], index: 1, kind: input, shape index: {}]   ;;  %s1092_s2 = inlined_call_operand.vmem [shape: f32[2,128], index: 2, kind: input, shape index: {}]   ;;  %s1093_s3 = inlined_call_operand.vmem [shape: f32[1,128], index: 3, kind: input, shape index: {}]   ;;  %s1094_s4 = inlined_call_operand.hbm [shape: f32[16,128], index: 4, kind: output, shape index: {}]  }
   0x1   :  { %11 = vsyncpa [#allocation4 + $0x1], 0 }
   0x2   :  { %12 = vsyncpa [#allocation7], 0 }
   0x3   :  { %13 = vsyncpa [#allocation5], 0 }
   0x4   :  { %15 = vsyncpa [#allocation5 + $0x1], 0  ;;  %s858_s15 = smov 0   ;;  %s860_s16 = smov 0  }
   0x5   :  { %s862_s17 = smov 0   ;;  %s864_s18 = smov 0  }
   0x6   :  { %s866_s19 = smov 0   ;;  %s868_s20 = smov 0  }
   0x7 LB: > { %s535_s21 = sadd.s32 4294967295, %s824_s20   ;;  %s536_s22 = sadd.s32 4294967294, %s824_s20   ;;  %s824_s20 = sphi %s868_s20, %s21_s20   ;;  %s820_s19 = sphi %s866_s19, %s1118_s19   ;;  %s816_s18 = sphi %s864_s18, %s1117_s18   ;;  %s812_s17 = sphi %s862_s17, %s1116_s17   ;;  %s808_s16 = sphi %s860_s16, %s1115_s16   ;;  %s804_s15 = sphi %s858_s15, %s1114_s15  }
   0x8   : > { %p53_p0 = scmp.ne.s32.totalorder %s808_s16, %s804_s15  ;;  %p892_p1 = scmp.eq.s32.totalorder %s535_s21, 0 }
   0x9   : > { %p896_p2 = scmp.eq.s32.totalorder %s535_s21, 1  ;;  %p158_p3 = scmp.eq.s32.totalorder %s536_s22, 1 }
   0xa   : > { %s1099_s23 = scalar_select %p892_p1, 1, 0 }
   0xb   : > { %s1100_s24 = scalar_select %p896_p2, 1, 0 }
   0xc   : > { %p902_p4 = por %p892_p1, %p53_p0  ;;  %p537_p5 = scmp.ge.s32.totalorder %s824_s20, 1 }
   0xd   : > { %p907_p6 = por %p158_p3, %p53_p0  ;;  %p165_p7 = scmp.lt.s32.totalorder %s824_s20, 3 }
   0xe   : > { %s1101_s25 = scalar_select %p902_p4, 1, 0 }
   0xf   : > { %s1102_s26 = scalar_select %p907_p6, 1, 0 }
  0x10   : > { %p912_p8 = pnand %p537_p5, %p165_p7  ;;  %s826_s28 = smov [#allocation6]  }
  0x11   : > { %s179_s29 = sshll.u32 %s826_s28, 4  ;;  %s33_s5 = sadd.s32 1, %s820_s19  ;;  %s180_s29 = int_to_ptr.vmem [resolvable:$true] %s179_s29 }
  0x12   : > { %s1103_s27 = scalar_select %p912_p8, 1, 0 }
  0x13   : > { %p599_p9 = pneg %p912_p8  ;;  %s680_s8 = scalar_lea.hbm %s1091_s1, 1024 }
  0x14   : > { %p681_p12 = scmp.ne.s32.totalorder %s1091_s1, %s680_s8  ;;  %p687_p5 = scmp.lt.u32.totalorder %s680_s8, %s1091_s1 }
  0x15   : > { %p921_p11 = pnand %p599_p9, %p892_p1 }
  0x17   : > { %p682_p13 = pneg %p921_p11 }
  0x19   : > { %p683_p0 = pnand %p682_p13, %p681_p12 }
  0x1b   : > { %p684_p3 = pneg %p683_p0 }
  0x1d   : > { %p689_p7 = pnand %p687_p5, %p684_p3 }
  0x1f   : > { %692 = shalt.err (!%p689_p7)
}
  0x20   : > { %s693_s13 = scalar_lea.vmem %s180_s29, 1024  ;;  %p701_p1 = scmp.lt.s32.totalorder %s180_s29, %s180_s29 }
  0x21   : > { %p694_p9 = scmp.ne.s32.totalorder %s180_s29, %s693_s13  ;;  %p702_p4 = scmp.lt.s32.totalorder %s693_s13, %s693_s13 }
  0x23   : > { %p696_p10 = pnand %p694_p9, %p682_p13  ;;  %p703_p8 = por %p702_p4, %p701_p1 }
  0x25   : > { %p697_p6 = pneg %p696_p10 }
  0x27   : > { %p704_p2 = pnand %p703_p8, %p697_p6 }
  0x29   : > { %707 = shalt.err (!%p704_p2)
}
  0x2a   : > { %s827_s14 = smov 64   ;;  %s828_s21 = smov 4  }
  0x2b   : > { %602 = dma.hbm_to_vmem [thread:$0]  (!%p921_p11), %s1091_s1, 1024, %s180_s29, [#allocation7], %s827_s14, %s827_s14, %s828_s21  }
  0x2c   : > { %p35_p1 = scmp.ge.s32.totalorder %s33_s5, 2  ;;  %s40_s6 = sadd.s32 1, %s812_s17 }
  0x2d   : > { %p47_p2 = scmp.ne.s32.totalorder %s812_s17, %s808_s16  ;;  %p48_p4 = scmp.eq.s32.totalorder %s824_s20, 0 }
  0x2e   : > { %s1120_s5 = smov (%p35_p1, %s33_s5), 0  ;;  %p1106_p8 = scmp.ne.s32.totalorder %s1100_s24, 0 }
  0x2f   : > { %p948_p6 = por %p48_p4, %p47_p2  ;;  %s37_s30 = ssub.s32 %s820_s19, %s1120_s5 }
  0x30   : > { %p954_p10 = por %p1106_p8, %p47_p2  ;;  %p612_p12 = scmp.lt.s32.totalorder %s824_s20, 2 }
  0x31   : > { %p38_p11 = scmp.eq.s32.totalorder %s37_s30, 0  ;;  %s202_s29 = sand.u32 1, %s812_s17  }
  0x32   : > { %s541_s9 = sshll.u32 %s202_s29, 3  ;;  %s542_s11 = sshll.u32 %s820_s19, 7 }
  0x33   : > { %s963_s10 = scalar_select %p38_p11, %s812_s17, %s40_s6  }
  0x34   : > { %s969_s14 = scalar_lea.hbm %s1090_s0, %s542_s11  ;;  %s206_s24 = scalar_lea.vmem [#allocation3], %s541_s9 }
  0x35   : > { %s213_s21 = sshll.u32 %s206_s24, 4  ;;  %p975_p13 = pnand %p612_p12, %p948_p6  ;;  %s971_s21 = int_to_ptr.vmem [resolvable:$true] %s213_s21 }
  0x36   : > { %s203_s28 = scalar_lea.sflag [#allocation4], %s202_s29  ;;  %s708_s6 = scalar_lea.hbm %s969_s14, 128 }
  0x37   : > { %p709_p0 = scmp.ne.s32.totalorder %s969_s14, %s708_s6  ;;  %p710_p3 = pneg %p975_p13 }
  0x38   : > { %s713_s11 = scalar_lea.hbm %s1090_s0, 256  ;;  %p714_p9 = scmp.lt.u32.totalorder %s969_s14, %s1090_s0 }
  0x39   : > { %p711_p5 = pnand %p710_p3, %p709_p0  ;;  %p715_p1 = scmp.lt.u32.totalorder %s713_s11, %s708_s6 }
  0x3a   : > { %p717_p4 = scmp.lt.u32.totalorder %s708_s6, %s969_s14 }
  0x3b   : > { %p712_p7 = pneg %p711_p5  ;;  %p716_p2 = por %p715_p1, %p714_p9 }
  0x3d   : > { %p718_p6 = por %p717_p4, %p716_p2 }
  0x3f   : > { %p719_p8 = pnand %p718_p6, %p712_p7 }
  0x41   : > { %722 = shalt.err (!%p719_p8)
}
  0x42   : > { %s723_s29 = scalar_lea.vmem %s971_s21, 128  ;;  %s829_s13 = smov [#allocation3]  }
  0x43   : > { %p724_p12 = scmp.ne.s32.totalorder %s971_s21, %s723_s29  ;;  %s728_s24 = sshll.u32 %s829_s13, 4  ;;  %s729_s24 = int_to_ptr.vmem [resolvable:$false] %s728_s24 }
  0x44   : > { %s730_s30 = scalar_lea.vmem %s729_s24, 256  ;;  %p731_p5 = scmp.lt.s32.totalorder %s971_s21, %s729_s24 }
  0x45   : > { %p726_p11 = pnand %p724_p12, %p710_p3  ;;  %p732_p9 = scmp.lt.s32.totalorder %s730_s30, %s723_s29 }
  0x47   : > { %p727_p0 = pneg %p726_p11  ;;  %p733_p1 = por %p732_p9, %p731_p5 }
  0x49   : > { %p734_p2 = pnand %p733_p1, %p727_p0 }
  0x4b   : > { %737 = shalt.err (!%p734_p2)
}
  0x4c   : > { %606 = dma.hbm_to_vmem [thread:$0]  (!%p975_p13), %s969_s14, 128, %s971_s21, %s203_s28  }
  0x4d   : > { %p1109_p7 = scmp.ne.s32.totalorder %s1103_s27, 0 }
  0x4e   : > { %s1007_s6 = sand.u32 (!%p1109_p7), 1, %s808_s16   ;;  %p1110_p3 = scmp.ne.s32.totalorder (!%p1109_p7), %s1101_s25, 0 }
  0x4f   : > { %222 = sbr.rel (%p1109_p7) target bundleno = 657 (0x291), region = 36  ;;  %s544_s9 = sshll.u32 (!%p1109_p7), %s1007_s6, 3 }
  0x50   : > { %s225_s11 = scalar_lea.sflag (!%p1109_p7), [#allocation4], %s1007_s6  ;;  %s228_s7 = scalar_lea.vmem (!%p1109_p7), [#allocation3], %s544_s9 }
  0x56   : > { %791 = dma.done.wait (%p1110_p3), %s225_s11, 128  }
  0x57   : > { %793 = vsyncadd (%p1110_p3), %s225_s11, 4294967168  ;;  %p1111_p13 = scmp.ne.s32.totalorder %s1099_s23, 0 }
  0x59   : > { %795 = dma.done.wait (%p1111_p13), [#allocation7], 1024  }
  0x5a   : > { %797 = vsyncadd (%p1111_p13), [#allocation7], 4294966272  ;;  %v1021_v0 = vld [vmem:[%s228_s7] sm:$0xff]  ;;  %v668_v5 = vld [vmem:[#allocation6] sm:$0xff]   ;;  %v830_v6 = vmov 0.0   ;;  %vm831_vm0 = vmmov 0  }
  0x5b   : > { %269 = vadd.xlane.f32.xlu0 %v1021_v0  ;;  %571 = vmatprep.subr.bf16.mxu0 %v830_v6  ;;  %v669_v7 = vld [vmem:[#allocation6 + $0x8] sm:$0xff]   ;;  %v670_v8 = vld [vmem:[#allocation6 + $0x10] sm:$0xff]   ;;  %v671_v9 = vld [vmem:[#allocation6 + $0x18] sm:$0xff]   ;;  %s559_s28 = sshll.u32 %s816_s18, 7  ;;  %s259_s12 = scalar_lea.vmem [#allocation8], %s544_s9 }
  0x5c   : > { %572 = vmatpush3.bf16.msra.mxu0 %v668_v5  ;;  %v672_v10 = vld [vmem:[#allocation6 + $0x20] sm:$0xff]   ;;  %v673_v11 = vld [vmem:[#allocation6 + $0x28] sm:$0xff]   ;;  %v674_v12 = vld [vmem:[#allocation6 + $0x30] sm:$0xff]   ;;  %587 = vmatprep.mubr.msk.bf16.mxu0 %vm831_vm0, %v830_v6  ;;  %s432_s29 = sshll.u32 %s259_s12, 4  ;;  %s1041_s30 = scalar_lea.hbm %s1094_s4, %s559_s28  ;;  %s1043_s29 = int_to_ptr.vmem [resolvable:$true] %s432_s29 }
  0x5d   : > { %573 = vmatprep.subr.bf16.mxu0 %v830_v6  ;;  %v675_v13 = vld [vmem:[#allocation6 + $0x38] sm:$0xff]   ;;  %v547_v22 = vld [vmem:[%s1092_s2] ss:$0 sm:$0xff]  ;;  %v548_v25 = vld [vmem:[%s1092_s2 + $0x1] ss:$0 sm:$0xff]  ;;  %s418_s18 = scalar_lea.sflag [#allocation5], %s1007_s6 }
  0x5e   : > { %v549_v30 = vld [vmem:[%s1093_s3] ss:$0 sm:$0xff]  ;;  %s738_s9 = scalar_lea.vmem %s1043_s29, 128  ;;  %s832_s11 = smov [#allocation8]  }
  0x5f   : > { %p739_p4 = scmp.ne.s32.totalorder %s1043_s29, %s738_s9  ;;  %s742_s7 = sshll.u32 %s832_s11, 4  ;;  %s743_s7 = int_to_ptr.vmem [resolvable:$false] %s742_s7 }
  0x60   : > { %574 = vmatpush3.bf16.msra.mxu0 %v669_v7  ;;  %s744_s23 = scalar_lea.vmem %s743_s7, 256  ;;  %p745_p12 = scmp.lt.s32.totalorder %s1043_s29, %s743_s7 }
  0x61   : > { %575 = vmatprep.subr.bf16.mxu0 %v830_v6  ;;  %p740_p6 = pnand %p739_p4, %p954_p10  ;;  %p746_p11 = scmp.lt.s32.totalorder %s744_s23, %s738_s9 }
  0x63   : > { %p741_p8 = pneg %p740_p6  ;;  %p747_p0 = por %p746_p11, %p745_p12 }
  0x64   : > { %576 = vmatpush3.bf16.msra.mxu0 %v670_v8 }
  0x65   : > { %577 = vmatprep.subr.bf16.mxu0 %v830_v6  ;;  %p748_p5 = pnand %p747_p0, %p741_p8 }
  0x68   : > { %578 = vmatpush3.bf16.msra.mxu0 %v671_v9 }
  0x69   : > { %579 = vmatprep.subr.bf16.mxu0 %v830_v6 }
  0x6c   : > { %580 = vmatpush3.bf16.msra.mxu0 %v672_v10 }
  0x6d   : > { %581 = vmatprep.subr.bf16.mxu0 %v830_v6 }
  0x70   : > { %582 = vmatpush3.bf16.msra.mxu0 %v673_v11 }
  0x71   : > { %583 = vmatprep.subr.bf16.mxu0 %v830_v6 }
  0x74   : > { %584 = vmatpush3.bf16.msra.mxu0 %v674_v12 }
  0x75   : > { %585 = vmatprep.subr.bf16.mxu0 %v830_v6 }
  0x78   : > { %586 = vmatpush3.bf16.msra.mxu0 %v675_v13 }
  0xe8   : > { %v270_v1 = vpop.xlane.xlu0 %269 }
  0xe9   : > { %v272_v2 = vmul.f32 0.0078125, %v270_v1 }
  0xeb   : > { %v273_v3 = vsub.f32 %v1021_v0, %v272_v2 }
  0xed   : > { %v274_v4 = vmul.f32 %v273_v3, %v273_v3 }
  0xef   : > { %275 = vadd.xlane.f32.xlu0 %v274_v4 }
 0x17c   : > { %v276_v14 = vpop.xlane.xlu0 %275 }
 0x17d   : > { %v277_v15 = vmul.f32 0.007874016, %v276_v14 }
 0x17f   : > { %676 = vrsqrt.f32 %v277_v15  ;;  %vm280_vm1 = vcmp.eq.f32.partialorder %v277_v15, inf  ;;  %v283_v18 = vand.u32 2147483648, %v277_v15  ;;  %vm282_vm2 = vcmp.eq.f32.partialorder %v277_v15, 0.0 }
 0x189   : > { %v677_v16 = vpop.eup %676 }
 0x18a   : > { %v279_v17 = vmul.f32 %v677_v16, %v277_v15 }
 0x18c   : > { %v281_v19 = vsel %vm280_vm1, %v277_v15, %v279_v17 }
 0x18d   : > { %v284_v20 = vsel %vm282_vm2, %v283_v18, %v281_v19 }
 0x18e   : > { %v285_v21 = vadd.f32 1e-06, %v284_v20 }
 0x190   : > { %678 = vrcp.f32 %v285_v21 }
 0x19a   : > { %v679_v23 = vpop.eup %678 }
 0x19b   : > { %v292_v24 = vmul.f32 %v679_v23, %v547_v22 }
 0x19d   : > { %v293_v26 = vmul.f32 %v292_v24, %v273_v3 }
 0x19f   : > { %v299_v27 = vadd.f32 %v548_v25, %v293_v26 }
 0x1a1   : > { %v300_v28 = vpack.c.bf16 %v299_v27, %v299_v27 }
 0x1a3   : > { %301 = vst [vmem:[#allocation2] sm:$0xf] %v300_v28 }
 0x1aa   : > { %v302_v29 = vld [vmem:[#allocation2] sm:$0xf] }
 0x1ab   : > { %588 = vmatmul.mubr.bf16.vlgmr.msra.gmra.mrb[0].mxu0 %v302_v29 }
 0x27e   : > { %v408_v31 = vpop.f32.mrb[0].mxu0 }
 0x27f   : > { %v409_v32 = vadd.f32 %v549_v30, %v408_v31  ;;  %v589_v33 = vpop.f32.mrb[1].mxu0 }
 0x280   : > { %v411_v34 = vpop.f32.mrb[2].mxu0 }
 0x281   : > { %v415_v35 = vadd.f32 %v409_v32, %v1021_v0  ;;  %v590_v36 = vpop.f32.mrb[3].mxu0 }
 0x283   : > { %416 = vst [vmem:[%s259_s12] sm:$0xff] %v415_v35 }
 0x284   : > { %751 = shalt.err (!%p748_p5)
}
 0x285   : > { %s752_s6 = scalar_lea.hbm %s1041_s30, 128  ;;  %s756_s14 = scalar_lea.hbm %s1094_s4, 256 }
 0x286   : > { %p753_p9 = scmp.ne.s32.totalorder %s1041_s30, %s752_s6  ;;  %p757_p7 = scmp.lt.u32.totalorder %s1041_s30, %s1094_s4 }
 0x287   : > { %p758_p3 = scmp.lt.u32.totalorder %s756_s14, %s752_s6  ;;  %p760_p4 = scmp.lt.u32.totalorder %s752_s6, %s1041_s30 }
 0x288   : > { %p754_p1 = pnand %p753_p9, %p954_p10 }
 0x289   : > { %p759_p13 = por %p758_p3, %p757_p7 }
 0x28a   : > { %p755_p2 = pneg %p754_p1 }
 0x28b   : > { %p761_p6 = por %p760_p4, %p759_p13 }
 0x28d   : > { %p762_p8 = pnand %p761_p6, %p755_p2 }
 0x28f   : > { %765 = shalt.err (!%p762_p8)
}
 0x290   : > { %597 = dma.vmem_to_hbm [thread:$0]  (%p954_p10), %s1043_s29, 128, %s1041_s30, %s418_s18  }
 0x291 PF: > { %s444_s28 = sand.u32 1, %s804_s15   ;;  %p1112_p12 = scmp.ne.s32.totalorder %s1102_s26, 0 }
 0x292   : > { %p1113_p11 = scmp.ge.s32.totalorder %s824_s20, 2  ;;  %s445_s12 = scalar_lea.sflag [#allocation5], %s444_s28 }
 0x294   : > { %p608_p0 = pnand %p1113_p11, %p1112_p12 }
 0x296   : > { %799 = dma.done.wait (!%p608_p0), %s445_s12, 128  }
 0x297   : > { %801 = vsyncadd (!%p608_p0), %s445_s12, 4294967168  ;;  %s21_s20 = sadd.s32 1, %s824_s20   ;;  %s1114_s15 = smov %s808_s16 }
 0x298   : > { %p18_p5 = scmp.ge.s32.totalorder %s21_s20, 4   ;;  %s1115_s16 = smov %s812_s17 }
 0x299   : > { %s1116_s17 = smov %s963_s10  ;;  %s1117_s18 = smov %s820_s19 }
 0x29a   : > { %s1118_s19 = smov %s1120_s5  ;;  %20 = sbr.rel (!%p18_p5) target bundleno = 7 (0x7), region = 93 }
 0x2a1   :  { %450 = vsyncpa [#allocation4], 1 }
 0x2a2   :  { %452 = vsyncpa [#allocation4 + $0x1], 1 }
 0x2a3   :  { %453 = vsyncpa [#allocation7], 1 }
 0x2a4   :  { %454 = vsyncpa [#allocation5], 1 }
 0x2a5   :  { %456 = vsyncpa [#allocation5 + $0x1], 1 }

</bundles_post_ra>
